<compile_context>
chip_gen: v6e
topology: v6e:2x2x1
jax: 0.10.0
libtpu: 0.0.40
codegen_flags: <defaults>
</compile_context>

<pallas_src>
import functools

import jax
import jax.numpy as jnp
from jax.experimental import pallas as pl
from jax.experimental.pallas import tpu as pltpu


# ----------------------------- Pallas kernel ------------------------------- #

def _attention_kernel(x_ref, wqkv_ref, bqkv_ref, wproj_ref, bproj_ref,
                      out_ref, cls_ref, acc_ref, cls_acc_ref,
                      *, bt, N, key_dim, d):
    """Grid = (batch_tiles, num_heads): one head of one batch tile per step."""
    h = pl.program_id(1)
    nh = pl.num_programs(1)

    @pl.when(h == 0)
    def _():
        acc_ref[...] = jnp.zeros_like(acc_ref)
        cls_acc_ref[...] = jnp.zeros_like(cls_acc_ref)

    x2 = x_ref[...]                                              # (bt*N, C) bf16

    # This head's fused q|k|v projection: one lane-dense bf16 matmul, f32 acc.
    # (scale already folded into the Q columns / bias host-side)
    qkv = jnp.dot(x2, wqkv_ref[0],
                  preferred_element_type=jnp.float32) + bqkv_ref[0]   # (bt*N, 2kd+d) f32

    q3 = qkv[:, :key_dim].astype(jnp.bfloat16).reshape(bt, N, key_dim)
    k3 = qkv[:, key_dim:2 * key_dim].astype(jnp.bfloat16).reshape(bt, N, key_dim)
    v3 = qkv[:, 2 * key_dim:].astype(jnp.bfloat16).reshape(bt, N, d)

    # Scores batched over the batch tile; contraction on LAST dims of both
    # operands (no materialized transpose).  Softmax stays f32.
    s = jnp.einsum('bnk,bmk->bnm', q3, k3,
                   preferred_element_type=jnp.float32)            # (bt, N, N)
    s = s - jnp.max(s, axis=-1, keepdims=True)
    p = jnp.exp(s)
    inv = pl.reciprocal(jnp.sum(p, axis=-1, keepdims=True), approx=True)
    attn = p * inv                                                # (bt, N, N) f32

    cls_acc_ref[...] += attn[:, 0, :]                             # sum_h attn[:,h,0,:]

    o = jnp.einsum('bnm,bmd->bnd', attn.astype(jnp.bfloat16), v3,
                   preferred_element_type=jnp.float32)            # (bt, N, d) f32
    # Hardswish per head == hardswish of the concat (elementwise).
    o = o * jnp.clip(o + 3.0, 0.0, 6.0) * (1.0 / 6.0)
    # Decomposed projection: out = sum_h hswish(o_h) @ Wp[h*d:(h+1)*d, :]
    acc_ref[...] += jnp.dot(o.astype(jnp.bfloat16).reshape(bt * N, d),
                            wproj_ref[0],
                            preferred_element_type=jnp.float32)   # (bt*N, C)

    @pl.when(h == nh - 1)
    def _():
        out_ref[...] = acc_ref[...] + bproj_ref[...]
        cls_ref[:, 0, :] = cls_acc_ref[...]


# ------------------------------ wrapper / glue ------------------------------ #

def _vmem_step_bytes(bt, N, C, per_head, d):
    x_tile = 2 * bt * N * C * 2          # bf16 x block, double-buffered
    out_tile = 2 * bt * N * C * 4        # f32 out block, double-buffered
    acc = bt * N * C * 4                 # projection accumulator scratch
    cls = bt * N * 4
    qkv = bt * N * per_head * 4          # per-head qkv result
    attn = 3 * bt * N * N * 4            # scores / exp / attn live values
    w = 2 * (C * per_head * 2 + per_head * 4 + d * C * 2 + C * 4)
    return x_tile + out_tile + acc + cls + qkv + attn + w


def _pick_b_tile(B, N, C, per_head, d, vmem_budget_bytes=20 * 1024 * 1024):
    """Largest legal batch tile under the VMEM budget.

    Legality: with x/out passed as 2-D (B*N, C), the block sublane extent
    bt*N must be a multiple of 8 or the full B*N.  When possible, keep at
    least 2 batch-grid steps so the "parallel" axis can shard across v7x's
    two TensorCores.
    """
    divs = [t for t in range(1, B + 1) if B % t == 0]
    legal = [t for t in divs if (t * N) % 8 == 0 or t == B]
    fits = [t for t in legal if _vmem_step_bytes(t, N, C, per_head, d)
            <= vmem_budget_bytes]
    cand = fits or legal or [B]
    multi = [t for t in cand if B // t >= 2]
    return max(multi or cand)


def attention_pallas(x, wqkv, bqkv, wproj, bproj,
                     *, num_heads, key_dim, attn_ratio, b_tile=None):
    """x: (B,N,C); wqkv: (C,h); bqkv: (h,); wproj: (dh,C); bproj: (C,)."""
    B, N, C = x.shape
    d = int(attn_ratio * key_dim)
    dh = d * num_heads
    per_head = 2 * key_dim + d
    h_total = num_heads * per_head
    scale = key_dim ** (-0.5)

    assert wqkv.shape == (C, h_total) and wproj.shape == (dh, C)

    # ---- host-side, one-time weight re-layout --------------------------------
    # original column order per head: [q | k | v]  (matches torch view/split).
    # -> per-head weight slab (nh, C, 2*kd+d) selected by BlockSpec, bf16,
    #    with the softmax scale folded into the Q columns (and Q bias).
    col_scale = jnp.concatenate(
        [jnp.full((key_dim,), scale, jnp.float32),
         jnp.ones((per_head - key_dim,), jnp.float32)])
    wqkv3 = jnp.transpose(
        jnp.reshape(wqkv.astype(jnp.float32), (C, num_heads, per_head)),
        (1, 0, 2))
    wqkv3 = (wqkv3 * col_scale[None, None, :]).astype(jnp.bfloat16)
    bqkv3 = (jnp.reshape(bqkv.astype(jnp.float32), (num_heads, 1, per_head))
             * col_scale[None, None, :])                          # stays f32
    wproj3 = jnp.reshape(wproj.astype(jnp.float32),
                         (num_heads, d, C)).astype(jnp.bfloat16)
    bproj2 = jnp.reshape(bproj.astype(jnp.float32), (1, C))

    bt = b_tile if b_tile is not None else _pick_b_tile(B, N, C, per_head, d)
    assert B % bt == 0 and ((bt * N) % 8 == 0 or bt == B)

    x2 = jnp.reshape(x, (B * N, C)).astype(jnp.bfloat16)          # 2-D, bf16

    vmem_limit = int(min(48 * 1024 * 1024,
                         max(32 * 1024 * 1024,
                             2 * _vmem_step_bytes(bt, N, C, per_head, d))))

    kernel = functools.partial(_attention_kernel,
                               bt=bt, N=N, key_dim=key_dim, d=d)

    out2, cls3 = pl.pallas_call(
        kernel,
        out_shape=(
            jax.ShapeDtypeStruct((B * N, C), jnp.float32),
            jax.ShapeDtypeStruct((B, 1, N), jnp.float32),
        ),
        grid_spec=pltpu.PrefetchScalarGridSpec(
            num_scalar_prefetch=0,
            grid=(B // bt, num_heads),
            in_specs=[
                pl.BlockSpec((bt * N, C), lambda b, h: (b, 0)),      # x (resident over h)
                pl.BlockSpec((1, C, per_head), lambda b, h: (h, 0, 0)),  # per-head qkv W
                pl.BlockSpec((1, 1, per_head), lambda b, h: (h, 0, 0)),  # per-head qkv b
                pl.BlockSpec((1, d, C), lambda b, h: (h, 0, 0)),     # per-head proj W
                pl.BlockSpec((1, C), lambda b, h: (0, 0)),           # proj bias
            ],
            out_specs=[
                pl.BlockSpec((bt * N, C), lambda b, h: (b, 0)),      # out (written at last h)
                pl.BlockSpec((bt, 1, N), lambda b, h: (b, 0, 0)),    # cls row 0
            ],
            scratch_shapes=[
                pltpu.VMEM((bt * N, C), jnp.float32),                # projection acc
                pltpu.VMEM((bt, N), jnp.float32),                    # cls acc
            ],
        ),
        compiler_params=pltpu.CompilerParams(
            dimension_semantics=("parallel", "arbitrary"),
            vmem_limit_bytes=vmem_limit),
    )(x2, wqkv3, bqkv3, wproj3, bproj2)

    out = jnp.reshape(out2, (B, N, C))
    # the [1:] slice and head-mean are free wrapper layout plumbing
    cls_attn = cls3[:, 0, 1:] / float(num_heads)
    return out, cls_attn


# --------------------------- parameter setup (glue) ------------------------ #

def fuse_linear_bn(W_in_out, gamma, beta, mean, var, eps=1e-5):
    """Fold inference-mode BatchNorm1d into a bias-free Linear (x @ W)."""
    s = gamma / jnp.sqrt(var + eps)
    return W_in_out * s[None, :], beta - mean * s


def make_params(key, dim, key_dim, num_heads, attn_ratio):
    d = int(attn_ratio * key_dim)
    dh = d * num_heads
    h = dh + 2 * key_dim * num_heads
    ks = jax.random.split(key, 10)

    # qkv Linear_BN
    w_qkv = jax.random.normal(ks[0], (dim, h), jnp.float32) * 0.05
    g_qkv = 1.0 + 0.1 * jax.random.normal(ks[1], (h,), jnp.float32)
    b_qkv = 0.1 * jax.random.normal(ks[2], (h,), jnp.float32)
    m_qkv = 0.1 * jax.random.normal(ks[3], (h,), jnp.float32)
    v_qkv = jnp.abs(1.0 + 0.1 * jax.random.normal(ks[4], (h,), jnp.float32))

    # proj Linear_BN (module inits BN weight to 0; random here so the synthetic
    # test output is non-trivial)
    w_prj = jax.random.normal(ks[5], (dh, dim), jnp.float32) * 0.05
    g_prj = 1.0 + 0.1 * jax.random.normal(ks[6], (dim,), jnp.float32)
    b_prj = 0.1 * jax.random.normal(ks[7], (dim,), jnp.float32)
    m_prj = 0.1 * jax.random.normal(ks[8], (dim,), jnp.float32)
    v_prj = jnp.abs(1.0 + 0.1 * jax.random.normal(ks[9], (dim,), jnp.float32))

    Wq, bq = fuse_linear_bn(w_qkv, g_qkv, b_qkv, m_qkv, v_qkv)
    Wp, bp = fuse_linear_bn(w_prj, g_prj, b_prj, m_prj, v_prj)
    return Wq, bq, Wp, bp


# ------------------------------ pure-JAX reference ------------------------- #

def attention_ref(x, wqkv, bqkv, wproj, bproj,
                  *, num_heads, key_dim, attn_ratio):
    B, N, C = x.shape
    d = int(attn_ratio * key_dim)
    dh = d * num_heads
    scale = key_dim ** (-0.5)

    qkv = x @ wqkv + bqkv                                   # (B, N, h)
    qkv = qkv.reshape(B, N, num_heads, 2 * key_dim + d)
    q = jnp.transpose(qkv[..., :key_dim], (0, 2, 1, 3))
    k = jnp.transpose(qkv[..., key_dim:2 * key_dim], (0, 2, 1, 3))
    v = jnp.transpose(qkv[..., 2 * key_dim:], (0, 2, 1, 3))

    attn = jax.nn.softmax(jnp.einsum('bhnk,bhmk->bhnm', q, k) * scale, axis=-1)
    cls_attn = jnp.mean(attn[:, :, 0, 1:], axis=1)          # (B, N-1)

    o = jnp.einsum('bhnm,bhmd->bhnd', attn, v)
    o = jnp.transpose(o, (0, 2, 1, 3)).reshape(B, N, dh)
    o = o * jnp.clip(o + 3.0, 0.0, 6.0) / 6.0               # Hardswish
    out = o @ wproj + bproj
    return out, cls_attn


# ----------------------------------- main ----------------------------------- #

if __name__ == "__main__":
    # Small, module-consistent shapes: dim=32, key_dim=8, heads=4, ratio=2,
    # tokens N = 4*4 spatial + 1 cls = 17.
    B, N, dim = 2, 17, 32
    key_dim, num_heads, attn_ratio = 8, 4, 2

    key = jax.random.PRNGKey(0)
    kx, kp = jax.random.split(key)
    x = jax.random.normal(kx, (B, N, dim), jnp.float32)
    Wq, bq, Wp, bp = make_params(kp, dim, key_dim, num_heads, attn_ratio)

    out, cls_attn = attention_pallas(
        x, Wq, bq, Wp, bp,
        num_heads=num_heads, key_dim=key_dim, attn_ratio=attn_ratio)
    out, cls_attn = jax.block_until_ready((out, cls_attn))

    ref_out, ref_cls = attention_ref(
        x, Wq, bq, Wp, bp,
        num_heads=num_heads, key_dim=key_dim, attn_ratio=attn_ratio)

    # tolerances account for bf16 MXU operands (f32 accumulation) and
    # pl.reciprocal(approx=True) in the softmax denominator
    assert jnp.allclose(out, ref_out, atol=2e-2, rtol=2e-2), "output mismatch"
    assert jnp.allclose(cls_attn, ref_cls, atol=2e-2, rtol=2e-2), "cls_attn mismatch"
    print("KERNEL_OK")
</pallas_src>

<mosaic_0001>
module attributes {stable_mosaic.version = 11 : i64} {
  func.func @_attention_kernel(%arg0: i32, %arg1: i32, %arg2: memref<34x32xbf16, #tpu.memory_space<vmem>>, %arg3: memref<1x32x32xbf16, #tpu.memory_space<vmem>>, %arg4: memref<1x1x32xf32, #tpu.memory_space<vmem>>, %arg5: memref<1x16x32xbf16, #tpu.memory_space<vmem>>, %arg6: memref<1x32xf32, #tpu.memory_space<vmem>>, %arg7: memref<34x32xf32, #tpu.memory_space<vmem>>, %arg8: memref<2x1x17xf32, #tpu.memory_space<vmem>>, %arg9: memref<34x32xf32, #tpu.memory_space<vmem>>, %arg10: memref<2x17xf32, #tpu.memory_space<vmem>>) attributes {dimension_semantics = [#tpu.dimension_semantics<parallel>, #tpu.dimension_semantics<arbitrary>], iteration_bounds = array<i64: 1, 4>, scalar_prefetch = 0 : i64, scratch_operands = 2 : i64, tpu.core_type = #tpu.core_type<tc>, window_params = [{transform_indices = @transform_0, window_bounds = array<i64: 34, 32>}, {transform_indices = @transform_1, window_bounds = array<i64: 1, 32, 32>}, {transform_indices = @transform_2, window_bounds = array<i64: 1, 1, 32>}, {transform_indices = @transform_3, window_bounds = array<i64: 1, 16, 32>}, {pipeline_mode = #tpu.pipeline_mode<synchronous>, transform_indices = @transform_4, window_bounds = array<i64: 1, 32>}, {transform_indices = @transform_5, window_bounds = array<i64: 34, 32>}, {transform_indices = @transform_6, window_bounds = array<i64: 2, 1, 17>}]} {
    %c0_i32 = arith.constant 0 : i32
    %0 = arith.cmpi eq, %arg1, %c0_i32 : i32
    %1 = arith.extui %0 : i1 to i32
    %c0_i32_0 = arith.constant 0 : i32
    %2 = arith.cmpi ne, %1, %c0_i32_0 : i32
    scf.if %2 {
      %cst_29 = arith.constant 0.000000e+00 : f32
      %58 = vector.broadcast %cst_29 : f32 to vector<34x32xf32>
      %c0_30 = arith.constant 0 : index
      %c0_31 = arith.constant 0 : index
      %59 = vector.load %arg9[%c0_30, %c0_31] : memref<34x32xf32, #tpu.memory_space<vmem>>, vector<34x32xf32>
      tpu.vector_store %arg9[%c0_30, %c0_31], %58 {strides = array<i32>} : memref<34x32xf32, #tpu.memory_space<vmem>>, vector<34x32xf32>,
      %cst_32 = arith.constant 0.000000e+00 : f32
      %60 = vector.broadcast %cst_32 : f32 to vector<2x17xf32>
      %c0_33 = arith.constant 0 : index
      %c0_34 = arith.constant 0 : index
      %61 = vector.load %arg10[%c0_33, %c0_34] : memref<2x17xf32, #tpu.memory_space<vmem>>, vector<2x17xf32>
      tpu.vector_store %arg10[%c0_33, %c0_34], %60 {strides = array<i32>} : memref<2x17xf32, #tpu.memory_space<vmem>>, vector<2x17xf32>,
    } else {
    }
    %c0 = arith.constant 0 : index
    %c0_1 = arith.constant 0 : index
    %3 = vector.load %arg2[%c0, %c0_1] : memref<34x32xbf16, #tpu.memory_space<vmem>>, vector<34x32xbf16>
    %c0_2 = arith.constant 0 : index
    %c0_3 = arith.constant 0 : index
    %c0_4 = arith.constant 0 : index
    %4 = vector.load %arg3[%c0_2, %c0_3, %c0_4] : memref<1x32x32xbf16, #tpu.memory_space<vmem>>, vector<1x32x32xbf16>
    %5 = vector.shape_cast %4 : vector<1x32x32xbf16> to vector<32x32xbf16>
    %cst = arith.constant dense<0.000000e+00> : vector<34x32xf32>
    %6 = tpu.matmul %3, %5, %cst {dimension_numbers = #tpu.dot_dimension_numbers<[1], [0], [0], [1], [0, 0, 1, 1], [], []>} : vector<34x32xbf16>, vector<32x32xbf16>, vector<34x32xf32> -> vector<34x32xf32>
    %c0_5 = arith.constant 0 : index
    %c0_6 = arith.constant 0 : index
    %c0_7 = arith.constant 0 : index
    %7 = vector.load %arg4[%c0_5, %c0_6, %c0_7] : memref<1x1x32xf32, #tpu.memory_space<vmem>>, vector<1x1x32xf32>
    %8 = vector.shape_cast %7 : vector<1x1x32xf32> to vector<1x32xf32>
    %9 = vector.broadcast %8 : vector<1x32xf32> to vector<34x32xf32>
    %10 = arith.addf %6, %9 : vector<34x32xf32>
    %11 = vector.extract_strided_slice %10 {offsets = [0, 0], sizes = [34, 8], strides = [1, 1]} : vector<34x32xf32> to vector<34x8xf32>
    %12 = arith.truncf %11 : vector<34x8xf32> to vector<34x8xbf16>
    %13 = vector.shape_cast %12 : vector<34x8xbf16> to vector<2x17x8xbf16>
    %14 = vector.extract_strided_slice %10 {offsets = [0, 8], sizes = [34, 8], strides = [1, 1]} : vector<34x32xf32> to vector<34x8xf32>
    %15 = arith.truncf %14 : vector<34x8xf32> to vector<34x8xbf16>
    %16 = vector.shape_cast %15 : vector<34x8xbf16> to vector<2x17x8xbf16>
    %17 = vector.extract_strided_slice %10 {offsets = [0, 16], sizes = [34, 16], strides = [1, 1]} : vector<34x32xf32> to vector<34x16xf32>
    %18 = arith.truncf %17 : vector<34x16xf32> to vector<34x16xbf16>
    %19 = vector.shape_cast %18 : vector<34x16xbf16> to vector<2x17x16xbf16>
    "tpu.trace_start"() <{level = 10 : i32, message = "bnk,bmk->bnm"}> : () -> ()
    %cst_8 = arith.constant dense<0.000000e+00> : vector<2x17x17xf32>
    %20 = tpu.matmul %13, %16, %cst_8 {dimension_numbers = #tpu.dot_dimension_numbers<[2], [2], [1], [1], [0, 0, 0, 1, 1, 1], [0], [0]>} : vector<2x17x8xbf16>, vector<2x17x8xbf16>, vector<2x17x17xf32> -> vector<2x17x17xf32>
    "tpu.trace_stop"() : () -> ()
    %cst_9 = arith.constant dense<0xFF800000> : vector<2x17xf32>
    %21 = vector.multi_reduction <maximumf>, %20, %cst_9 [2] : vector<2x17x17xf32> to vector<2x17xf32>
    %22 = vector.shape_cast %21 : vector<2x17xf32> to vector<2x17x1xf32>
    %23 = vector.broadcast %22 : vector<2x17x1xf32> to vector<2x17x17xf32>
    %24 = arith.subf %20, %23 : vector<2x17x17xf32>
    %25 = math.exp %24 : vector<2x17x17xf32>
    %cst_10 = arith.constant dense<0.000000e+00> : vector<2x17xf32>
    %26 = vector.multi_reduction <add>, %25, %cst_10 [2] : vector<2x17x17xf32> to vector<2x17xf32>
    %27 = vector.shape_cast %26 : vector<2x17xf32> to vector<2x17x1xf32>
    %28 = tpu.reciprocal %27 {approx = true} : vector<2x17x1xf32> -> vector<2x17x1xf32>
    %29 = vector.broadcast %28 : vector<2x17x1xf32> to vector<2x17x17xf32>
    %30 = arith.mulf %25, %29 : vector<2x17x17xf32>
    %c0_11 = arith.constant 0 : index
    %c0_12 = arith.constant 0 : index
    %31 = vector.load %arg10[%c0_11, %c0_12] : memref<2x17xf32, #tpu.memory_space<vmem>>, vector<2x17xf32>
    %32 = vector.extract_strided_slice %30 {offsets = [0, 0, 0], sizes = [2, 1, 17], strides = [1, 1, 1]} : vector<2x17x17xf32> to vector<2x1x17xf32>
    %33 = vector.shape_cast %32 : vector<2x1x17xf32> to vector<2x17xf32>
    %34 = arith.addf %31, %33 : vector<2x17xf32>
    %c0_13 = arith.constant 0 : index
    %c0_14 = arith.constant 0 : index
    %35 = vector.load %arg10[%c0_13, %c0_14] : memref<2x17xf32, #tpu.memory_space<vmem>>, vector<2x17xf32>
    tpu.vector_store %arg10[%c0_13, %c0_14], %34 {strides = array<i32>} : memref<2x17xf32, #tpu.memory_space<vmem>>, vector<2x17xf32>,
    %36 = arith.truncf %30 : vector<2x17x17xf32> to vector<2x17x17xbf16>
    "tpu.trace_start"() <{level = 10 : i32, message = "bnm,bmd->bnd"}> : () -> ()
    %cst_15 = arith.constant dense<0.000000e+00> : vector<2x17x16xf32>
    %37 = tpu.matmul %36, %19, %cst_15 {dimension_numbers = #tpu.dot_dimension_numbers<[2], [1], [1], [2], [0, 0, 0, 1, 1, 2], [0], [0]>} : vector<2x17x17xbf16>, vector<2x17x16xbf16>, vector<2x17x16xf32> -> vector<2x17x16xf32>
    "tpu.trace_stop"() : () -> ()
    %cst_16 = arith.constant 3.000000e+00 : f32
    %38 = vector.broadcast %cst_16 : f32 to vector<2x17x16xf32>
    %39 = arith.addf %37, %38 : vector<2x17x16xf32>
    %cst_17 = arith.constant 0.000000e+00 : f32
    %cst_18 = arith.constant 6.000000e+00 : f32
    %40 = vector.broadcast %cst_17 : f32 to vector<2x17x16xf32>
    %41 = arith.maximumf %40, %39 : vector<2x17x16xf32>
    %42 = vector.broadcast %cst_18 : f32 to vector<2x17x16xf32>
    %43 = arith.minimumf %42, %41 : vector<2x17x16xf32>
    %44 = arith.mulf %37, %43 : vector<2x17x16xf32>
    %cst_19 = arith.constant 0.166666672 : f32
    %45 = vector.broadcast %cst_19 : f32 to vector<2x17x16xf32>
    %46 = arith.mulf %44, %45 : vector<2x17x16xf32>
    %c0_20 = arith.constant 0 : index
    %c0_21 = arith.constant 0 : index
    %47 = vector.load %arg9[%c0_20, %c0_21] : memref<34x32xf32, #tpu.memory_space<vmem>>, vector<34x32xf32>
    %48 = arith.truncf %46 : vector<2x17x16xf32> to vector<2x17x16xbf16>
    %49 = vector.shape_cast %48 : vector<2x17x16xbf16> to vector<34x16xbf16>
    %c0_22 = arith.constant 0 : index
    %c0_23 = arith.constant 0 : index
    %c0_24 = arith.constant 0 : index
    %50 = vector.load %arg5[%c0_22, %c0_23, %c0_24] : memref<1x16x32xbf16, #tpu.memory_space<vmem>>, vector<1x16x32xbf16>
    %51 = vector.shape_cast %50 : vector<1x16x32xbf16> to vector<16x32xbf16>
    %cst_25 = arith.constant dense<0.000000e+00> : vector<34x32xf32>
    %52 = tpu.matmul %49, %51, %cst_25 {dimension_numbers = #tpu.dot_dimension_numbers<[1], [0], [0], [1], [0, 0, 1, 1], [], []>} : vector<34x16xbf16>, vector<16x32xbf16>, vector<34x32xf32> -> vector<34x32xf32>
    %53 = arith.addf %47, %52 : vector<34x32xf32>
    %c0_26 = arith.constant 0 : index
    %c0_27 = arith.constant 0 : index
    %54 = vector.load %arg9[%c0_26, %c0_27] : memref<34x32xf32, #tpu.memory_space<vmem>>, vector<34x32xf32>
    tpu.vector_store %arg9[%c0_26, %c0_27], %53 {strides = array<i32>} : memref<34x32xf32, #tpu.memory_space<vmem>>, vector<34x32xf32>,
    %c3_i32 = arith.constant 3 : i32
    %55 = arith.cmpi eq, %arg1, %c3_i32 : i32
    %56 = arith.extui %55 : i1 to i32
    %c0_i32_28 = arith.constant 0 : i32
    %57 = arith.cmpi ne, %56, %c0_i32_28 : i32
    scf.if %57 {
      %c0_29 = arith.constant 0 : index
      %c0_30 = arith.constant 0 : index
      %58 = vector.load %arg9[%c0_29, %c0_30] : memref<34x32xf32, #tpu.memory_space<vmem>>, vector<34x32xf32>
      %c0_31 = arith.constant 0 : index
      %c0_32 = arith.constant 0 : index
      %59 = vector.load %arg6[%c0_31, %c0_32] : memref<1x32xf32, #tpu.memory_space<vmem>>, vector<1x32xf32>
      %60 = vector.broadcast %59 : vector<1x32xf32> to vector<34x32xf32>
      %61 = arith.addf %58, %60 : vector<34x32xf32>
      %c0_33 = arith.constant 0 : index
      %c0_34 = arith.constant 0 : index
      %62 = vector.load %arg7[%c0_33, %c0_34] : memref<34x32xf32, #tpu.memory_space<vmem>>, vector<34x32xf32>
      tpu.vector_store %arg7[%c0_33, %c0_34], %61 {strides = array<i32>} : memref<34x32xf32, #tpu.memory_space<vmem>>, vector<34x32xf32>,
      %c0_35 = arith.constant 0 : index
      %c0_36 = arith.constant 0 : index
      %63 = vector.load %arg10[%c0_35, %c0_36] : memref<2x17xf32, #tpu.memory_space<vmem>>, vector<2x17xf32>
      %c0_37 = arith.constant 0 : index
      %c0_38 = arith.constant 0 : index
      %c0_39 = arith.constant 0 : index
      %64 = vector.load %arg8[%c0_37, %c0_38, %c0_39] : memref<2x1x17xf32, #tpu.memory_space<vmem>>, vector<2x1x17xf32>
      %65 = vector.shape_cast %64 : vector<2x1x17xf32> to vector<2x17xf32>
      %66 = vector.shape_cast %63 : vector<2x17xf32> to vector<2x1x17xf32>
      tpu.vector_store %arg8[%c0_37, %c0_38, %c0_39], %66 {strides = array<i32>} : memref<2x1x17xf32, #tpu.memory_space<vmem>>, vector<2x1x17xf32>,
    } else {
    }
    return
  }
  func.func @transform_0(%arg0: i32, %arg1: i32) -> (i32, i32) {
    %c0_i32 = arith.constant 0 : i32
    %c0_i32_0 = arith.constant 0 : i32
    return %arg0, %c0_i32 : i32, i32
  }
  func.func @transform_1(%arg0: i32, %arg1: i32) -> (i32, i32, i32) {
    %c0_i32 = arith.constant 0 : i32
    %c0_i32_0 = arith.constant 0 : i32
    %c0_i32_1 = arith.constant 0 : i32
    return %arg1, %c0_i32, %c0_i32_0 : i32, i32, i32
  }
  func.func @transform_2(%arg0: i32, %arg1: i32) -> (i32, i32, i32) {
    %c0_i32 = arith.constant 0 : i32
    %c0_i32_0 = arith.constant 0 : i32
    %c0_i32_1 = arith.constant 0 : i32
    return %arg1, %c0_i32, %c0_i32_0 : i32, i32, i32
  }
  func.func @transform_3(%arg0: i32, %arg1: i32) -> (i32, i32, i32) {
    %c0_i32 = arith.constant 0 : i32
    %c0_i32_0 = arith.constant 0 : i32
    %c0_i32_1 = arith.constant 0 : i32
    return %arg1, %c0_i32, %c0_i32_0 : i32, i32, i32
  }
  func.func @transform_4(%arg0: i32, %arg1: i32) -> (i32, i32) {
    %c0_i32 = arith.constant 0 : i32
    %c0_i32_0 = arith.constant 0 : i32
    %c0_i32_1 = arith.constant 0 : i32
    return %c0_i32, %c0_i32_0 : i32, i32
  }
  func.func @transform_5(%arg0: i32, %arg1: i32) -> (i32, i32) {
    %c0_i32 = arith.constant 0 : i32
    %c0_i32_0 = arith.constant 0 : i32
    return %arg0, %c0_i32 : i32, i32
  }
  func.func @transform_6(%arg0: i32, %arg1: i32) -> (i32, i32, i32) {
    %c0_i32 = arith.constant 0 : i32
    %c0_i32_0 = arith.constant 0 : i32
    %c0_i32_1 = arith.constant 0 : i32
    return %arg0, %c0_i32, %c0_i32_0 : i32, i32, i32
  }
}

</mosaic_0001>

<bundles_post_ra>
// kernel: tpu_custom_call.1
= control target key start
LH: loop header
LB: loop body
LE: loop exit
PB: predicated region body
PF: predicated region fallthrough
CT: control target
= control target key end

     0   :  { %12 = vsyncpa [#allocation5], 0  ;;  %s2434_s0 = inlined_call_operand.vmem [shape: bf16[34,32], index: 0, kind: input, shape index: {}]   ;;  %s2435_s1 = inlined_call_operand.hbm [shape: bf16[4,32,32], index: 1, kind: input, shape index: {}]   ;;  %s2436_s2 = inlined_call_operand.vmem [shape: f32[4,1,32], index: 2, kind: input, shape index: {}]   ;;  %s2437_s3 = inlined_call_operand.vmem [shape: bf16[4,16,32], index: 3, kind: input, shape index: {}]   ;;  %s2438_s4 = inlined_call_operand.vmem [shape: f32[1,32], index: 4, kind: input, shape index: {}]   ;;  %s2439_s5 = inlined_call_operand.vmem [shape: f32[34,32], index: 5, kind: output, shape index: {0}]   ;;  %s2440_s6 = inlined_call_operand.hbm [shape: f32[2,1,17], index: 6, kind: output, shape index: {1}]  }
   0x1   :  { %14 = vsyncpa [#allocation5 + $0x1], 0 }
   0x2   :  { %15 = vsyncpa [#allocation6], 0  ;;  %s2131_s21 = smov 0   ;;  %s2133_s22 = smov 0  }
   0x3   :  { %s2135_s23 = smov 0   ;;  %s2137_s24 = smov 0  }
   0x4   :  { %s2139_s25 = smov 0   ;;  %s2141_s26 = smov 0  }
   0x5 LB: > { %s1712_s27 = sadd.s32 4294967295, %s2081_s26   ;;  %s30_s28 = sadd.s32 1, %s2077_s25  ;;  %s2081_s26 = sphi %s2141_s26, %s21_s26   ;;  %s2077_s25 = sphi %s2139_s25, %s2449_s25   ;;  %s2073_s24 = sphi %s2137_s24, %s2448_s24   ;;  %s2069_s23 = sphi %s2135_s23, %s2447_s23   ;;  %s2065_s22 = sphi %s2133_s22, %s2446_s22   ;;  %s2061_s21 = sphi %s2131_s21, %s2445_s21  }
   0x6   : > { %p31_p0 = scmp.ge.s32.totalorder %s30_s28, 4  ;;  %s66_s29 = sadd.s32 1, %s2069_s23 }
   0x7   : > { %p73_p1 = scmp.ne.s32.totalorder %s2069_s23, %s2065_s22  ;;  %p74_p2 = scmp.eq.s32.totalorder %s2081_s26, 0 }
   0x8   : > { %s2451_s28 = smov (%p31_p0, %s30_s28), 0  ;;  %p79_p4 = scmp.ne.s32.totalorder %s2065_s22, %s2061_s21 }
   0x9   : > { %p2167_p3 = por %p74_p2, %p73_p1  ;;  %s63_s7 = ssub.s32 %s2077_s25, %s2451_s28 }
   0xa   : > { %p80_p5 = scmp.eq.s32.totalorder %s1712_s27, 0  ;;  %p64_p6 = scmp.eq.s32.totalorder %s63_s7, 0 }
   0xb   : > { %p1882_p8 = scmp.lt.s32.totalorder %s2081_s26, 4  ;;  %s240_s10 = sand.u32 1, %s2069_s23  }
   0xc   : > { %p2176_p7 = por %p80_p5, %p79_p4  ;;  %s1779_s11 = sshll.u32 %s2077_s25, 8 }
   0xd   : > { %s2182_s9 = scalar_select %p64_p6, %s2069_s23, %s66_s29  }
   0xe   : > { %s1716_s12 = sshll.u32 %s240_s10, 4  ;;  %s250_s15 = scalar_lea.hbm %s2435_s1, %s1779_s11 }
   0xf   : > { %s244_s16 = scalar_lea.vmem [#allocation4], %s1716_s12  ;;  %p2191_p9 = pnand %p1882_p8, %p2167_p3 }
  0x10   : > { %s251_s17 = sshll.u32 %s244_s16, 4  ;;  %s241_s19 = scalar_lea.sflag [#allocation5], %s240_s10  ;;  %s252_s17 = int_to_ptr.vmem [resolvable:$true] %s251_s17 }
  0x11   : > { %p1977_p10 = pneg %p2191_p9  ;;  %s1988_s20 = scalar_lea.vmem %s252_s17, 256 }
  0x12   : > { %p1989_p11 = scmp.ne.s32.totalorder %s252_s17, %s1988_s20  ;;  %s2083_s21 = smov [#allocation4]  }
  0x13   : > { %s1993_s29 = sshll.u32 %s2083_s21, 4  ;;  %s1994_s29 = int_to_ptr.vmem [resolvable:$false] %s1993_s29 }
  0x14   : > { %p1991_p12 = pnand %p1989_p11, %p1977_p10  ;;  %s1995_s7 = scalar_lea.vmem %s1994_s29, 512 }
  0x15   : > { %p1996_p0 = scmp.lt.s32.totalorder %s252_s17, %s1994_s29  ;;  %p1997_p1 = scmp.lt.s32.totalorder %s1995_s7, %s1988_s20 }
  0x16   : > { %p1992_p13 = pneg %p1991_p12 }
  0x17   : > { %p1998_p2 = por %p1997_p1, %p1996_p0 }
  0x19   : > { %p1999_p3 = pnand %p1998_p2, %p1992_p13 }
  0x1b   : > { %2002 = shalt.err (!%p1999_p3)
}
  0x1c   : > { %s2084_s30 = smov 64   ;;  %s2085_s10 = smov 4  }
  0x1d   : > { %1881 = dma.hbm_to_vmem [thread:$0]  (!%p2191_p9), %s250_s15, 256, %s252_s17, %s241_s19, %s2084_s30, %s2084_s30, %s2085_s10  }
  0x1e   : > { %p1719_p4 = scmp.ge.s32.totalorder %s2081_s26, 1  ;;  %p273_p5 = scmp.lt.s32.totalorder %s2081_s26, 5 }
  0x20   : > { %p274_p6 = pnand %p1719_p4, %p273_p5 }
  0x21   : > { %s279_s11 = sand.u32 (!%p274_p6), 1, %s2065_s22  }
  0x22   : > { %277 = sbr.rel (%p274_p6) target bundleno = 1453 (0x5ad), region = 40  ;;  %s1720_s12 = sshll.u32 (!%p274_p6), %s279_s11, 4 }
  0x23   : > { %s280_s13 = scalar_lea.sflag (!%p274_p6), [#allocation5], %s279_s11  ;;  %s283_s14 = scalar_lea.vmem (!%p274_p6), [#allocation4], %s1720_s12 }
  0x27   : > { %2052 = dma.done.wait (%p2176_p7), %s280_s13, 256  }
  0x28   : > { %2054 = vsyncadd (%p2176_p7), %s280_s13, 4294967040  ;;  %p331_p8 = scmp.lt.s32.totalorder %s2073_s24, 3  ;;  %p1723_p9 = scmp.ne.s32.totalorder %s2073_s24, 0 }
  0x2a   : > { %s2208_s16 = scalar_select %p331_p8, %s2073_s24, 3 }
  0x2b   : > { %350 = sbr.rel (%p1723_p9) target bundleno = 53 (0x35), region = 48 }
  0x2c   : > { %s333_s18 = scalar_lea.vmem %s2436_s2, %s2208_s16  ;;  %s1780_s19 = sshll.u32 %s2208_s16, 3 }
  0x2d   : > { %s2218_s29 = scalar_lea.vmem %s2437_s3, %s1780_s19 }
  0x30   : > { %vm351_vm0 = vcmask 261120   ;;  %vm356_vm1 = vcmask 254976   ;;  %vm358_vm2 = vcmask 132096   ;;  %v2086_v0 = vmov 0.0  }
  0x31   : > { %352 = vst.msk [vmem:[#allocation2] sm:$0xff] %vm351_vm0, %v2086_v0  ;;  %353 = vst.msk [vmem:[#allocation2 + $0x8] sm:$0xff] %vm351_vm0, %v2086_v0 }
  0x32   : > { %354 = vst.msk [vmem:[#allocation2 + $0x10] sm:$0xff] %vm351_vm0, %v2086_v0  ;;  %355 = vst.msk [vmem:[#allocation2 + $0x18] sm:$0xff] %vm351_vm0, %v2086_v0 }
  0x33   : > { %357 = vst.msk [vmem:[#allocation2 + $0x20] sm:$0x3] %vm356_vm1, %v2086_v0 }
  0x34   : > { %359 = vst.msk [vmem:[#allocation3] sm:$0x3] %vm358_vm2, %v2086_v0 }
  0x35 PF: > { %v1945_v1 = vld [vmem:[%s283_s14 + $0x8] sm:$0xff]   ;;  %v2087_v2 = vmov 0.0   ;;  %v1946_v3 = vld [vmem:[%s283_s14] sm:$0xff]   ;;  %vm2088_vm3 = vmmov 0   ;;  %vm401_vm4 = vcmask 261120   ;;  %v477_v9 = vlaneseq  ;;  %s2090_s16 = smov 120  }
  0x36   : > { %1806 = vmatprep.subr.bf16.mxu1 %v2087_v2  ;;  %1810 = vmatprep.mubr.msk.bf16.mxu1 %vm2088_vm3, %v2087_v2  ;;  %v1947_v4 = vld [vmem:[%s2434_s0] sm:$0xff]   ;;  %v1948_v5 = vld [vmem:[%s2434_s0 + $0x8] sm:$0xff]   ;;  %v1949_v6 = vld [vmem:[%s2434_s0 + $0x10] ss:$0 sps:$4 sm:$0x11]   ;;  %vm695_vm5 = vcmask 64512  }
  0x37   : > { %1807 = vmatpush3.bf16.msra.mxu1 %v1945_v1  ;;  %v2089_v7 = vmov 1966171168   ;;  %v478_v12 = vshrl.u32 %v477_v9, 7  ;;  %v1724_v13 = vld [vmem:[%s333_s18] ss:$0 sm:$0xff]  ;;  %vm892_vm6 = vcmask 138240  }
  0x38   : > { %1808 = vmatprep.subr.bf16.mxu1 %v2087_v2  ;;  %v475_v8 = vunpack.c.l.s4 %v2089_v7  ;;  %vm899_vm7 = vcmask 131072   ;;  %s2091_s15 = smov 112   ;;  %vm985_vm8 = vcmask 1040384   ;;  %vm964_vm9 = vcmask 1041409   ;;  %p1770_p7 = scmp.ne.s32.totalorder %s2073_s24, 3 }
  0x39   : > { %vm968_vm10 = vcmask 132096   ;;  %vm1441_vm11 = vcmask 130048   ;;  %vm1516_vm12 = vcmask 254976  }
  0x3a   : > { %v476_v11 = vunpack.c.0.s8 %v475_v8 }
  0x3b   : > { %1809 = vmatpush3.bf16.msra.mxu1 %v1946_v3 }
  0x3c   : > { %v2246_v18 = vsub.s32 %v476_v11, %v478_v12 }
  0x3e   : > { %1811 = vmatmul.mubr.msk.bf16.vlgmr.msra.gmra.mxu1 %vm401_vm4, %v1947_v4 }
  0x3f   : > { %1814 = vmatprep.mubr.msk.bf16.mxu1 %vm2088_vm3, %v2087_v2 }
  0x46   : > { %1815 = vmatmul.mubr.msk.bf16.gmra.mxu1 %vm401_vm4, %v1948_v5 }
  0x47   : > { %1818 = vmatprep.mubr.msk.bf16.mxu1 %vm2088_vm3, %v2087_v2 }
  0x4e   : > { %1819 = vmatmul.mubr.msk.bf16.gmra.mxu1 %vm401_vm4, %v1949_v6 }
  0xfe   : > { %v445_v10 = vpop.f32.mrf.mxu1 }
  0xff   : > { %v446_v16 = vadd.f32 %v1724_v13, %v445_v10 }
 0x100   : > { %v1812_v14 = vpop.f32.mrf.mxu1 }
 0x102   : > { %v448_v15 = vpop.f32.mrf.mxu1 }
 0x103   : > { %v449_v17 = vadd.f32 %v1724_v13, %v448_v15 }
 0x104   : > { %v1813_v19 = vpop.f32.mrf.mxu1 }
 0x105   : > { %v467_v20 = vpack.c.bf16 %v449_v17, %v446_v16  ;;  %v1733_v21 = vpack.c.bf16 %v449_v17, %v449_v17 }
 0x106   : > { %v453_v22 = vpop.f32.mrf.mxu1 }
 0x107   : > { %v480_v23 = vrot.slane %v467_v20, %v2246_v18  ;;  %v487_v24 = vrot.slane %v1733_v21, %v2246_v18  ;;  %v454_v34 = vadd.f32 %v1724_v13, %v453_v22 }
 0x108   : > { %v1816_v25 = vpop.f32.mrf.mxu1 }
 0x109   : > { %v488_v26 = vcombine.high %v480_v23, %v480_v23  ;;  %v489_v27 = vcombine.high %v487_v24, %v487_v24  ;;  %v496_v28 = vrot.slane %v480_v23, %v2246_v18  ;;  %v503_v30 = vrot.slane %v487_v24, %v2246_v18 }
 0x10a   : > { %v456_v29 = vpop.f32.mrf.mxu1 }
 0x10b   : > { %v510_v31 = vrot.slane %v488_v26, %v2246_v18  ;;  %v517_v32 = vrot.slane %v489_v27, %v2246_v18  ;;  %v457_v33 = vadd.f32 %v1724_v13, %v456_v29 }
 0x10c   : > { %v1817_v35 = vpop.f32.mrf.mxu1 }
 0x10d   : > { %v628_v36 = vcombine.low %v496_v28, %v510_v31  ;;  %v1735_v37 = vcombine.high %v496_v28, %v510_v31  ;;  %v630_v38 = vcombine.low %v503_v30, %v517_v32  ;;  %v1736_v39 = vcombine.high %v503_v30, %v517_v32 }
 0x10e   : > { %v468_v40 = vpack.c.bf16 %v457_v33, %v454_v34  ;;  %v1734_v41 = vpack.c.bf16 %v457_v33, %v457_v33  ;;  %v461_v42 = vpop.f32.mrf.mxu1 }
 0x10f   : > { %v638_v43 = vrot.slane %v628_v36, %v2246_v18  ;;  %v645_v44 = vrot.slane %v1735_v37, %v2246_v18  ;;  %v652_v45 = vrot.slane %v630_v38, %v2246_v18  ;;  %v659_v46 = vrot.slane %v1736_v39, %v2246_v18 }
 0x110   : > { %v529_v47 = vrot.slane %v468_v40, %v2246_v18  ;;  %v536_v48 = vrot.slane %v1734_v41, %v2246_v18  ;;  %v462_v49 = vadd.f32 %v1724_v13, %v461_v42  ;;  %v1820_v50 = vpop.f32.mrf.mxu1 }
 0x111   : > { %v660_v51 = vcombine.low %v638_v43, %v645_v44  ;;  %v661_v52 = vcombine.low %v652_v45, %v659_v46 }
 0x112   : > { %v537_v53 = vcombine.high %v529_v47, %v529_v47  ;;  %v538_v54 = vcombine.high %v536_v48, %v536_v48  ;;  %v545_v55 = vrot.slane %v529_v47, %v2246_v18  ;;  %v552_v56 = vrot.slane %v536_v48, %v2246_v18  ;;  %v464_v57 = vpop.f32.mrf.mxu1 }
 0x113   : > { %v469_v58 = vpack.c.bf16 %v462_v49, %v462_v49  ;;  %v668_v59 = vrot.slane %v660_v51, %v2246_v18  ;;  %v675_v60 = vrot.slane %v661_v52, %v2246_v18 }
 0x114   : > { %v559_v61 = vrot.slane %v537_v53, %v2246_v18  ;;  %v566_v62 = vrot.slane %v538_v54, %v2246_v18  ;;  %v567_v63 = vcombine.high %v545_v55, %v545_v55  ;;  %v568_v0 = vcombine.high %v552_v56, %v552_v56  ;;  %v1821_v1 = vpop.f32.mrf.mxu1 }
 0x115   : > { %v602_v3 = vunpack.i.h.s16 %v545_v55  ;;  %v610_v4 = vunpack.i.h.s16 %v552_v56  ;;  %v577_v5 = vrot.slane %v469_v58, %v2246_v18  ;;  %v2267_v6 = vcombine.low %v668_v59, %v675_v60 }
 0x116   : > { %v569_v7 = vcombine.high %v559_v61, %v559_v61  ;;  %v604_v8 = vunpack.i.h.s16 %v559_v61  ;;  %v606_v9 = vunpack.i.h.s16 %v567_v63  ;;  %v612_v10 = vunpack.i.h.s16 %v566_v62 }
 0x117   : > { %v1739_v11 = vpack.i.b16 %v559_v61, %v602_v3  ;;  %v570_v12 = vcombine.high %v566_v62, %v566_v62  ;;  %v584_v13 = vrot.slane %v577_v5, %v2246_v18  ;;  %1826 = vmatprep.mubr.msk.bf16.mxu1 %vm695_vm5, %v2267_v6  ;;  %v614_v17 = vunpack.i.h.s16 %v568_v0 }
 0x118   : > { %v608_v14 = vunpack.i.h.s16 %v569_v7  ;;  %v1740_v15 = vpack.i.b16 %v567_v63, %v604_v8  ;;  %v1744_v16 = vpack.i.b16 %v568_v0, %v612_v10  ;;  %v1743_v19 = vpack.i.b16 %v566_v62, %v610_v4 }
 0x119   : > { %v616_v20 = vunpack.i.h.s16 %v570_v12  ;;  %v618_v21 = vunpack.i.h.s16 %v584_v13  ;;  %v601_v22 = vunpack.i.l.s16 %v545_v55  ;;  %v1745_v24 = vpack.i.b16 %v570_v12, %v614_v17 }
 0x11a   : > { %v1742_v23 = vpack.i.b16 %v552_v56, %v608_v14  ;;  %v1741_v25 = vpack.i.b16 %v569_v7, %v606_v9  ;;  %v765_v26 = vcombine.low %v1739_v11, %v1740_v15  ;;  %v767_v30 = vcombine.low %v1743_v19, %v1744_v16 }
 0x11b   : > { %v1746_v27 = vpack.i.b16 %v584_v13, %v616_v20  ;;  %v683_v28 = vrot.slane %v601_v22, %v2246_v18  ;;  %v820_v29 = vrot.slane %v618_v21, %v2246_v18  ;;  %v2092_v13 = vmov 0  }
 0x11c   : > { %v766_v31 = vcombine.low %v1741_v25, %v1742_v23  ;;  %v775_v35 = vrot.slane %v765_v26, %v2246_v18  ;;  %v789_v37 = vrot.slane %v767_v30, %v2246_v18  ;;  %v987_v14 = vsel %vm985_vm8, 65535, %v2092_v13 }
 0x11d   : > { %v768_v32 = vcombine.low %v1745_v24, %v1746_v27  ;;  %v690_v33 = vrot.slane %v683_v28, %v2246_v18  ;;  %v2276_v34 = vrot.slane %v820_v29, %v2246_v18 }
 0x11e   : > { %v782_v36 = vrot.slane %v766_v31, %v2246_v18 }
 0x11f   : > { %693 = vrot.lane.b32.xlu0 %v690_v33, %s2090_s16  ;;  %830 = vrot.lane.b32.xlu1 %v2276_v34, %s2090_s16  ;;  %v796_v38 = vrot.slane %v768_v32, %v2246_v18 }
 0x120   : > { %v797_v39 = vcombine.low %v775_v35, %v782_v36 }
 0x121   : > { %v798_v40 = vcombine.low %v789_v37, %v796_v38 }
 0x122   : > { %v805_v41 = vrot.slane %v797_v39, %v2246_v18 }
 0x123   : > { %691 = vrot.lane.b32.xlu0 %v2267_v6, %s2090_s16  ;;  %v812_v42 = vrot.slane %v798_v40, %v2246_v18 }
 0x125   : > { %v2286_v43 = vcombine.low %v805_v41, %v812_v42 }
 0x127   : > { %1834 = vmatprep.mubr.msk.bf16.mxu0 %vm695_vm5, %v2286_v43  ;;  %828 = vrot.lane.b32.xlu1 %v2286_v43, %s2090_s16 }
 0x191   : > { %v694_v44 = vpop.permute.xlu0 %693  ;;  %v831_v45 = vpop.permute.xlu1 %830 }
 0x192   : > { %v706_v46 = vsel %vm695_vm5, %v694_v44, 0  ;;  %1868 = vmatprep.subr.msk.bf16.mxu1 %vm695_vm5, %v694_v44  ;;  %1870 = vmatprep.subr.msk.bf16.mxu0 %vm695_vm5, %v831_v45  ;;  %v842_v47 = vsel %vm695_vm5, %v831_v45, 0 }
 0x193   : > { %1823 = vmatpush3.bf16.xpose.msra.mxu1 %v706_v46  ;;  %1831 = vmatpush3.bf16.xpose.msra.mxu0 %v842_v47 }
 0x195   : > { %v692_v48 = vpop.permute.xlu0 %691 }
 0x196   : > { %1869 = vmatprep.subr.msk.bf16.mxu1 %vm695_vm5, %v692_v48  ;;  %v703_v50 = vsel %vm695_vm5, %v692_v48, 0 }
 0x199   : > { %v829_v49 = vpop.permute.xlu1 %828 }
 0x19a   : > { %1871 = vmatprep.subr.msk.bf16.mxu0 %vm695_vm5, %v829_v49  ;;  %v839_v51 = vsel %vm695_vm5, %v829_v49, 0 }
 0x19b   : > { %1825 = vmatpush3.bf16.xpose.msra.mxu1 %v703_v50  ;;  %1833 = vmatpush3.bf16.xpose.msra.mxu0 %v839_v51 }
 0x19c   : > { %1854 = vmatprep.subr.bf16.mxu0 %v2087_v2 }
 0x1a2   : > { %1827 = vmatmul.mubr.msk.bf16.vlgmr.msra.gmra.mxu1 %vm695_vm5, %v690_v33  ;;  %1835 = vmatmul.mubr.msk.bf16.vlgmr.msra.gmra.mxu0 %vm695_vm5, %v2276_v34 }
 0x1a3   : > { %1856 = vmatprep.mubr.msk.bf16.mxu0 %vm2088_vm3, %v2087_v2 }
 0x262   : > { %v1828_v52 = vpop.f32.mrf.mxu1  ;;  %v1836_v53 = vpop.f32.mrf.mxu0 }
 0x263   : > { %v900_v61 = vsel %vm899_vm7, %v1828_v52, -inf  ;;  %v909_v1 = vsel %vm899_vm7, %v1836_v53, -inf }
 0x264   : > { %v742_v54 = vpop.f32.mrf.mxu1  ;;  %v878_v55 = vpop.f32.mrf.mxu0 }
 0x265   : > { %v893_v56 = vsel %vm892_vm6, %v742_v54, -inf  ;;  %v903_v0 = vsel %vm892_vm6, %v878_v55, -inf }
 0x266   : > { %894 = vmax.xlane.f32.xlu0 %v893_v56  ;;  %v1829_v57 = vpop.f32.mrf.mxu1  ;;  %v1837_v58 = vpop.f32.mrf.mxu0  ;;  %v960_v56 = vld [vmem:[#allocation3] sm:$0x3] }
 0x268   : > { %v745_v59 = vpop.f32.mrf.mxu1  ;;  %v881_v60 = vpop.f32.mrf.mxu0 }
 0x269   : > { %v896_v62 = vsel %vm892_vm6, %v745_v59, -inf  ;;  %v906_v63 = vsel %vm892_vm6, %v881_v60, -inf }
 0x26a   : > { %901 = vmax.xlane.f32.xlu0 %v900_v61  ;;  %897 = vmax.xlane.f32.xlu1 %v896_v62 }
 0x26e   : > { %904 = vmax.xlane.f32.xlu0 %v903_v0  ;;  %907 = vmax.xlane.f32.xlu1 %v906_v63 }
 0x272   : > { %910 = vmax.xlane.f32.xlu0 %v909_v1 }
 0x27f   : > { %976 = vrot.lane.b32.xlu1 %v690_v33, %s2091_s15 }
 0x2ef   : > { %v895_v3 = vpop.xlane.xlu0 %894 }
 0x2f0   : > { %v912_v4 = vsub.f32 %v742_v54, %v895_v3 }
 0x2f2   : > { %v918_v9 = vmul.f32 1.442695, %v912_v4 }
 0x2f3   : > { %v902_v5 = vpop.xlane.xlu0 %901  ;;  %v898_v7 = vpop.xlane.xlu1 %897 }
 0x2f4   : > { %v914_v8 = vsub.f32 %v1828_v52, %v902_v5  ;;  %v913_v15 = vsub.f32 %v745_v59, %v898_v7  ;;  %v1950_v5 = vld [vmem:[%s2218_s29] sm:$0xff]  }
 0x2f5   : > { %1855 = vmatpush3.bf16.msra.mxu0 %v1950_v5 }
 0x2f6   : > { %v922_v10 = vmul.f32 1.442695, %v914_v8  ;;  %v920_v21 = vmul.f32 1.442695, %v913_v15 }
 0x2f7   : > { %v905_v11 = vpop.xlane.xlu0 %904  ;;  %v908_v12 = vpop.xlane.xlu1 %907 }
 0x2f8   : > { %1951 = vpow2.f32 %v922_v10  ;;  %v915_v22 = vsub.f32 %v878_v55, %v905_v11  ;;  %v916_v36 = vsub.f32 %v881_v60, %v908_v12 }
 0x2f9   : > { %1953 = vpow2.f32 %v918_v9 }
 0x2fa   : > { %v924_v24 = vmul.f32 1.442695, %v915_v22  ;;  %v926_v37 = vmul.f32 1.442695, %v916_v36 }
 0x2fb   : > { %v911_v16 = vpop.xlane.xlu0 %910  ;;  %v977_v17 = vpop.permute.xlu1 %976 }
 0x2fc   : > { %v917_v19 = vsub.f32 %v1836_v53, %v911_v16  ;;  %v989_v20 = vand.u32 %v987_v14, %v977_v17 }
 0x2fe   : > { %v928_v23 = vmul.f32 1.442695, %v917_v19  ;;  %1838 = vmatprep.subr.bf16.mxu1 %v989_v20 }
 0x2ff   : > { %1839 = vmatpush3.bf16.msra.mxu1 %v989_v20 }
 0x300   : > { %1955 = vpow2.f32 %v928_v23 }
 0x301   : > { %1957 = vpow2.f32 %v920_v21 }
 0x302   : > { %1959 = vpow2.f32 %v924_v24 }
 0x303   : > { %1961 = vpow2.f32 %v926_v37 }
 0x305   : > { %v1952_v25 = vpop.eup %1951 }
 0x306   : > { %v936_v26 = vsel %vm899_vm7, %v1952_v25, 0.0  ;;  %v1954_v27 = vpop.eup %1953 }
 0x307   : > { %937 = vadd.xlane.f32.xlu1 %v936_v26  ;;  %v930_v28 = vsel %vm892_vm6, %v1954_v27, 0.0 }
 0x30b   : > { %931 = vadd.xlane.f32.xlu1 %v930_v28 }
 0x30d   : > { %v1956_v29 = vpop.eup %1955 }
 0x30e   : > { %v945_v30 = vsel %vm899_vm7, %v1956_v29, 0.0  ;;  %v1958_v31 = vpop.eup %1957 }
 0x30f   : > { %946 = vadd.xlane.f32.xlu0 %v945_v30  ;;  %v933_v32 = vsel %vm892_vm6, %v1958_v31, 0.0  ;;  %v1960_v33 = vpop.eup %1959 }
 0x310   : > { %v939_v35 = vsel %vm892_vm6, %v1960_v33, 0.0  ;;  %v1962_v38 = vpop.eup %1961 }
 0x311   : > { %v942_v39 = vsel %vm892_vm6, %v1962_v38, 0.0 }
 0x313   : > { %934 = vadd.xlane.f32.xlu0 %v933_v32 }
 0x317   : > { %940 = vadd.xlane.f32.xlu0 %v939_v35 }
 0x31c   : > { %1041 = vrot.lane.b32.xlu1 %v2276_v34, %s2091_s15 }
 0x32d   : > { %974 = vrot.lane.b32.xlu0 %v2267_v6, %s2091_s15 }
 0x340   : > { %943 = vadd.xlane.f32.xlu1 %v942_v39 }
 0x351   : > { %1039 = vrot.lane.b32.xlu1 %v2286_v43, %s2091_s15 }
 0x390   : > { %v938_v40 = vpop.xlane.xlu1 %937 }
 0x391   : > { %1963 = vrcp.f32 %v938_v40 }
 0x394   : > { %v932_v41 = vpop.xlane.xlu1 %931 }
 0x395   : > { %1965 = vrcp.f32 %v932_v41 }
 0x398   : > { %v947_v42 = vpop.xlane.xlu0 %946  ;;  %v1042_v45 = vpop.permute.xlu1 %1041 }
 0x399   : > { %v1051_v6 = vand.u32 %v1042_v45, %v987_v14 }
 0x39c   : > { %v935_v44 = vpop.xlane.xlu0 %934 }
 0x39d   : > { %1967 = vrcp.f32 %v935_v44 }
 0x39e   : > { %v1964_v47 = vpop.eup %1963 }
 0x39f   : > { %v956_v50 = vmul.f32 %v1964_v47, %v1952_v25 }
 0x3a0   : > { %v941_v34 = vpop.xlane.xlu0 %940 }
 0x3a1   : > { %1969 = vrcp.f32 %v941_v34  ;;  %v971_v54 = vpack.c.bf16 %v956_v50, %v956_v50 }
 0x3a2   : > { %v1966_v48 = vpop.eup %1965  ;;  %1971 = vrcp.f32 %v947_v42 }
 0x3a3   : > { %v954_v43 = vmul.f32 %v1966_v48, %v1954_v27 }
 0x3a4   : > { %v975_v46 = vpop.permute.xlu0 %974 }
 0x3a5   : > { %1840 = vmatprep.subr.bf16.mxu1 %v975_v46 }
 0x3a6   : > { %1841 = vmatpush3.bf16.msra.mxu1 %v975_v46 }
 0x3a7   : > { %1846 = vmatprep.subr.bf16.mxu1 %v1051_v6 }
 0x3aa   : > { %v1968_v49 = vpop.eup %1967 }
 0x3ab   : > { %v955_v51 = vmul.f32 %v1968_v49, %v1958_v31 }
 0x3ad   : > { %v970_v52 = vpack.c.bf16 %v955_v51, %v954_v43 }
 0x3ae   : > { %v1970_v53 = vpop.eup %1969 }
 0x3af   : > { %1842 = vmatprep.mubr.msk.bf16.mxu1 %vm892_vm6, %v970_v52  ;;  %v957_v55 = vmul.f32 %v1970_v53, %v1960_v33  ;;  %v1972_v62 = vpop.eup %1971 }
 0x3b0   : > { %1843 = vmatmul.mubr.msk.bf16.vlgmr.msra.gmra.mxu1 %vm892_vm6, %v971_v54  ;;  %v959_v0 = vmul.f32 %v1972_v62, %v1956_v29 }
 0x3b1   : > { %1847 = vmatpush3.bf16.msra.mxu1 %v1051_v6  ;;  %v963_v57 = vrot.slane %v957_v55, 7 }
 0x3b2   : > { %v973_v4 = vpack.c.bf16 %v959_v0, %v959_v0 }
 0x3b3   : > { %v965_v58 = vsel %vm964_vm9, %v963_v57, %v954_v43 }
 0x3b4   : > { %v967_v59 = vadd.f32 %v965_v58, %v960_v56 }
 0x3b6   : > { %969 = vst.msk [vmem:[#allocation3] sm:$0x3] %vm968_vm10, %v967_v59 }
 0x3c9   : > { %v944_v60 = vpop.xlane.xlu1 %943 }
 0x3ca   : > { %1973 = vrcp.f32 %v944_v60 }
 0x3cd   : > { %v1040_v61 = vpop.permute.xlu1 %1039 }
 0x3ce   : > { %1848 = vmatprep.subr.bf16.mxu1 %v1040_v61 }
 0x3cf   : > { %1849 = vmatpush3.bf16.msra.mxu1 %v1040_v61 }
 0x3d7   : > { %v1974_v63 = vpop.eup %1973 }
 0x3d8   : > { %v958_v1 = vmul.f32 %v1974_v63, %v1962_v38 }
 0x3da   : > { %v972_v3 = vpack.c.bf16 %v958_v1, %v957_v55 }
 0x3dc   : > { %1850 = vmatprep.mubr.msk.bf16.mxu1 %vm892_vm6, %v972_v3 }
 0x3dd   : > { %1851 = vmatmul.mubr.msk.bf16.vlgmr.msra.gmra.mxu1 %vm892_vm6, %v973_v4 }
 0x470   : > { %v1844_v7 = vpop.f32.mrf.mxu1 }
 0x471   : > { %v1103_v46 = vadd.f32 3.0, %v1844_v7 }
 0x472   : > { %v1025_v8 = vpop.f32.mrf.mxu1 }
 0x473   : > { %v1101_v9 = vadd.f32 3.0, %v1025_v8  ;;  %v1109_v6 = vmax.f32 %v1103_v46, 0.0 }
 0x474   : > { %v1845_v10 = vpop.f32.mrf.mxu1 }
 0x475   : > { %v1107_v11 = vmax.f32 %v1101_v9, 0.0  ;;  %v1115_v50 = vmin.f32 %v1109_v6, 6.0 }
 0x476   : > { %v1028_v12 = vpop.f32.mrf.mxu1 }
 0x477   : > { %v1113_v13 = vmin.f32 %v1107_v11, 6.0  ;;  %v1102_v14 = vadd.f32 3.0, %v1028_v12  ;;  %v1121_v55 = vmul.f32 %v1844_v7, %v1115_v50 }
 0x479   : > { %v1108_v15 = vmax.f32 %v1102_v14, 0.0  ;;  %v1119_v16 = vmul.f32 %v1113_v13, %v1025_v8  ;;  %v1127_v60 = vmul.f32 0.16666667, %v1121_v55 }
 0x47b   : > { %v1114_v17 = vmin.f32 %v1108_v15, 6.0  ;;  %v1125_v20 = vmul.f32 0.16666667, %v1119_v16  ;;  %v1137_v1 = vpack.c.bf16 %v1127_v60, %v1127_v60 }
 0x47d   : > { %v1120_v19 = vmul.f32 %v1114_v17, %v1028_v12  ;;  %v1199_v10 = vrot.slane %v1137_v1, %v2246_v18 }
 0x47f   : > { %v1126_v21 = vmul.f32 0.16666667, %v1120_v19 }
 0x481   : > { %v1136_v22 = vpack.c.bf16 %v1126_v21, %v1125_v20  ;;  %v1753_v23 = vpack.c.bf16 %v1126_v21, %v1126_v21  ;;  %v1206_v20 = vrot.slane %v1199_v10, %v2246_v18 }
 0x483   : > { %v1151_v24 = vrot.slane %v1136_v22, %v2246_v18  ;;  %v1158_v25 = vrot.slane %v1753_v23, %v2246_v18 }
 0x485   : > { %v1159_v26 = vcombine.high %v1151_v24, %v1151_v24  ;;  %v1160_v27 = vcombine.high %v1158_v25, %v1158_v25  ;;  %v1167_v28 = vrot.slane %v1151_v24, %v2246_v18  ;;  %v1174_v29 = vrot.slane %v1158_v25, %v2246_v18 }
 0x487   : > { %v1181_v30 = vrot.slane %v1159_v26, %v2246_v18  ;;  %v1188_v31 = vrot.slane %v1160_v27, %v2246_v18 }
 0x489   : > { %v1323_v32 = vcombine.low %v1167_v28, %v1181_v30  ;;  %v1764_v33 = vcombine.high %v1167_v28, %v1181_v30  ;;  %v1325_v35 = vcombine.low %v1174_v29, %v1188_v31  ;;  %v1765_v36 = vcombine.high %v1174_v29, %v1188_v31 }
 0x48b   : > { %v1333_v37 = vrot.slane %v1323_v32, %v2246_v18  ;;  %v1340_v38 = vrot.slane %v1764_v33, %v2246_v18  ;;  %v1347_v39 = vrot.slane %v1325_v35, %v2246_v18  ;;  %v1354_v40 = vrot.slane %v1765_v36, %v2246_v18 }
 0x48d   : > { %v1355_v41 = vcombine.low %v1333_v37, %v1340_v38  ;;  %v1356_v42 = vcombine.low %v1347_v39, %v1354_v40 }
 0x48f   : > { %v1363_v44 = vrot.slane %v1355_v41, %v2246_v18  ;;  %v1370_v34 = vrot.slane %v1356_v42, %v2246_v18 }
 0x491   : > { %v1371_v45 = vcombine.low %v1363_v44, %v1370_v34 }
 0x493   : > { %1857 = vmatmul.mubr.msk.bf16.vlgmr.msra.gmra.mxu0 %vm1441_vm11, %v1371_v45 }
 0x494   : > { %1860 = vmatprep.mubr.msk.bf16.mxu0 %vm2088_vm3, %v2087_v2 }
 0x49d   : > { %v1852_v47 = vpop.f32.mrf.mxu1 }
 0x49e   : > { %v1106_v56 = vadd.f32 3.0, %v1852_v47 }
 0x49f   : > { %v1087_v48 = vpop.f32.mrf.mxu1 }
 0x4a0   : > { %v1104_v49 = vadd.f32 3.0, %v1087_v48  ;;  %v1112_v61 = vmax.f32 %v1106_v56, 0.0 }
 0x4a1   : > { %v1853_v43 = vpop.f32.mrf.mxu1 }
 0x4a2   : > { %v1110_v51 = vmax.f32 %v1104_v49, 0.0  ;;  %v1118_v3 = vmin.f32 %v1112_v61, 6.0 }
 0x4a3   : > { %v1090_v52 = vpop.f32.mrf.mxu1 }
 0x4a4   : > { %v1116_v53 = vmin.f32 %v1110_v51, 6.0  ;;  %v1105_v54 = vadd.f32 3.0, %v1090_v52  ;;  %v1124_v7 = vmul.f32 %v1852_v47, %v1118_v3  ;;  %v1133_v3 = vld [vmem:[#allocation2 + $0x10] sm:$0xff] }
 0x4a6   : > { %v1111_v57 = vmax.f32 %v1105_v54, 0.0  ;;  %v1122_v58 = vmul.f32 %v1116_v53, %v1087_v48  ;;  %v1130_v21 = vmul.f32 0.16666667, %v1124_v7 }
 0x4a8   : > { %v1117_v59 = vmin.f32 %v1111_v57, 6.0  ;;  %v1128_v63 = vmul.f32 0.16666667, %v1122_v58  ;;  %v1139_v39 = vpack.c.bf16 %v1130_v21, %v1130_v21  ;;  %v1131_v58 = vld [vmem:[#allocation2] sm:$0xff] }
 0x4aa   : > { %v1123_v62 = vmul.f32 %v1117_v59, %v1090_v52  ;;  %v1262_v6 = vrot.slane %v1139_v39, %v2246_v18 }
 0x4ac   : > { %v1129_v0 = vmul.f32 0.16666667, %v1123_v62  ;;  %v1269_v51 = vrot.slane %v1262_v6, %v2246_v18  ;;  %v1132_v62 = vld [vmem:[#allocation2 + $0x8] sm:$0xff] }
 0x4ae   : > { %v1138_v4 = vpack.c.bf16 %v1129_v0, %v1128_v63  ;;  %v1754_v5 = vpack.c.bf16 %v1129_v0, %v1129_v0 }
 0x4b0   : > { %v1214_v8 = vrot.slane %v1138_v4, %v2246_v18  ;;  %v1221_v9 = vrot.slane %v1754_v5, %v2246_v18 }
 0x4b2   : > { %v1222_v11 = vcombine.high %v1214_v8, %v1214_v8  ;;  %v1223_v12 = vcombine.high %v1221_v9, %v1221_v9  ;;  %v1230_v13 = vrot.slane %v1214_v8, %v2246_v18  ;;  %v1237_v14 = vrot.slane %v1221_v9, %v2246_v18  ;;  %v1134_v8 = vld [vmem:[#allocation2 + $0x18] sm:$0xff] }
 0x4b4   : > { %v1244_v15 = vrot.slane %v1222_v11, %v2246_v18  ;;  %v1251_v16 = vrot.slane %v1223_v12, %v2246_v18  ;;  %v1252_v17 = vcombine.high %v1230_v13, %v1230_v13  ;;  %v1253_v19 = vcombine.high %v1237_v14, %v1237_v14  ;;  %v1135_v11 = vld [vmem:[#allocation2 + $0x20] sm:$0x3] }
 0x4b5   : > { %v1288_v22 = vunpack.i.h.s16 %v1230_v13  ;;  %v1296_v23 = vunpack.i.h.s16 %v1237_v14  ;;  %v1755_v30 = vpack.i.b16 %v1230_v13, %v1206_v20 }
 0x4b6   : > { %v1254_v24 = vcombine.high %v1244_v15, %v1244_v15  ;;  %v1255_v25 = vcombine.high %v1251_v16, %v1251_v16  ;;  %v1290_v26 = vunpack.i.h.s16 %v1244_v15  ;;  %v1292_v27 = vunpack.i.h.s16 %v1252_v17 }
 0x4b7   : > { %v1298_v28 = vunpack.i.h.s16 %v1251_v16  ;;  %v1300_v29 = vunpack.i.h.s16 %v1253_v19  ;;  %v1756_v31 = vpack.i.b16 %v1244_v15, %v1288_v22  ;;  %v1760_v41 = vpack.i.b16 %v1251_v16, %v1296_v23 }
 0x4b8   : > { %v1294_v32 = vunpack.i.h.s16 %v1254_v24  ;;  %v1757_v33 = vpack.i.b16 %v1252_v17, %v1290_v26  ;;  %v1758_v35 = vpack.i.b16 %v1254_v24, %v1292_v27  ;;  %v1302_v43 = vunpack.i.h.s16 %v1255_v25 }
 0x4b9   : > { %v1761_v36 = vpack.i.b16 %v1253_v19, %v1298_v28  ;;  %v1762_v37 = vpack.i.b16 %v1255_v25, %v1300_v29  ;;  %v1372_v38 = vcombine.low %v1755_v30, %v1756_v31 }
 0x4ba   : > { %v1759_v40 = vpack.i.b16 %v1237_v14, %v1294_v32  ;;  %v1373_v42 = vcombine.low %v1757_v33, %v1758_v35  ;;  %v1763_v55 = vpack.i.b16 %v1269_v51, %v1302_v43 }
 0x4bb   : > { %v1375_v44 = vcombine.low %v1761_v36, %v1762_v37  ;;  %v1382_v45 = vrot.slane %v1372_v38, %v2246_v18 }
 0x4bc   : > { %v1374_v34 = vcombine.low %v1759_v40, %v1760_v41  ;;  %v1389_v46 = vrot.slane %v1373_v42, %v2246_v18  ;;  %v1427_v56 = vrot.slane %v1763_v55, %v2246_v18 }
 0x4bd   : > { %v1403_v48 = vrot.slane %v1375_v44, %v2246_v18 }
 0x4be   : > { %v1396_v47 = vrot.slane %v1374_v34, %v2246_v18  ;;  %v1404_v49 = vcombine.low %v1382_v45, %v1389_v46  ;;  %v1434_v57 = vrot.slane %v1427_v56, %v2246_v18 }
 0x4c0   : > { %v1405_v50 = vcombine.low %v1396_v47, %v1403_v48  ;;  %v1412_v52 = vrot.slane %v1404_v49, %v2246_v18 }
 0x4c2   : > { %v1419_v53 = vrot.slane %v1405_v50, %v2246_v18 }
 0x4c4   : > { %v1420_v54 = vcombine.low %v1412_v52, %v1419_v53 }
 0x4c6   : > { %1861 = vmatmul.mubr.msk.bf16.gmra.mxu0 %vm1441_vm11, %v1420_v54 }
 0x4c7   : > { %1864 = vmatprep.mubr.msk.bf16.mxu0 %vm2088_vm3, %v2087_v2 }
 0x4ce   : > { %1865 = vmatmul.mubr.msk.bf16.gmra.mxu0 %vm1441_vm11, %v1434_v57 }
 0x553   : > { %v1485_v59 = vpop.f32.mrf.mxu0 }
 0x554   : > { %v1507_v60 = vadd.f32 %v1485_v59, %v1131_v58 }
 0x555   : > { %v1858_v61 = vpop.f32.mrf.mxu0 }
 0x556   : > { %1512 = vst.msk [vmem:[#allocation2] sm:$0xff] %vm401_vm4, %v1507_v60 }
 0x557   : > { %v1488_v63 = vpop.f32.mrf.mxu0 }
 0x558   : > { %v1508_v0 = vadd.f32 %v1488_v63, %v1132_v62 }
 0x559   : > { %v1859_v1 = vpop.f32.mrf.mxu0 }
 0x55a   : > { %1513 = vst.msk [vmem:[#allocation2 + $0x8] sm:$0xff] %vm401_vm4, %v1508_v0 }
 0x586   : > { %v1493_v2 = vpop.f32.mrf.mxu0 }
 0x587   : > { %v1509_v4 = vadd.f32 %v1493_v2, %v1133_v3 }
 0x588   : > { %v1862_v5 = vpop.f32.mrf.mxu0 }
 0x589   : > { %1514 = vst.msk [vmem:[#allocation2 + $0x10] sm:$0xff] %vm401_vm4, %v1509_v4 }
 0x58a   : > { %v1496_v9 = vpop.f32.mrf.mxu0 }
 0x58b   : > { %v1510_v10 = vadd.f32 %v1496_v9, %v1134_v8 }
 0x58c   : > { %v1863_v7 = vpop.f32.mrf.mxu0 }
 0x58d   : > { %1515 = vst.msk [vmem:[#allocation2 + $0x18] sm:$0xff] %vm401_vm4, %v1510_v10 }
 0x58e   : > { %v1501_v12 = vpop.f32.mrf.mxu0 }
 0x58f   : > { %v1511_v13 = vadd.f32 %v1501_v12, %v1135_v11 }
 0x590   : > { %v1866_v14 = vpop.f32.mrf.mxu0  ;;  %1521 = sbr.rel (%p1770_p7) target bundleno = 1437 (0x59d), region = 52 }
 0x591   : > { %1517 = vst.msk [vmem:[#allocation2 + $0x20] sm:$0x3] %vm1516_vm12, %v1511_v13 }
 0x592   : > { %v1504_v15 = vpop.f32.mrf.mxu0 }
 0x594   : > { %v1867_v16 = vpop.f32.mrf.mxu0 }
 0x595   : > { %v1522_v17 = vld [vmem:[#allocation2] sm:$0xff]  ;;  %v1523_v20 = vld [vmem:[#allocation2 + $0x8] sm:$0xff]  ;;  %v1524_v23 = vld [vmem:[#allocation2 + $0x10] sm:$0xff] }
 0x596   : > { %v1771_v19 = vld [vmem:[%s2438_s4] ss:$0 sm:$0xff]  ;;  %v1525_v24 = vld [vmem:[#allocation2 + $0x18] sm:$0xff] }
 0x597   : > { %v1534_v21 = vadd.f32 %v1771_v19, %v1522_v17  ;;  %v1535_v22 = vadd.f32 %v1771_v19, %v1523_v20  ;;  %v1536_v26 = vadd.f32 %v1771_v19, %v1524_v23  ;;  %v1537_v27 = vadd.f32 %v1771_v19, %v1525_v24  ;;  %v1772_v29 = vld.sshfl [vmem:[#allocation3] sm:$0x11 pattern:$0x75316420] }
 0x598   : > { %v1526_v25 = vld [vmem:[#allocation2 + $0x20] sm:$0x3]  ;;  %v1560_v30 = vrot.slane %v1772_v29, %v2246_v18  ;;  %v1553_v31 = vcombine.high %v1772_v29, %v1772_v29 }
 0x599   : > { %v1538_v28 = vadd.f32 %v1771_v19, %v1526_v25  ;;  %1539 = vst.msk [vmem:[%s2439_s5] sm:$0xff] %vm401_vm4, %v1534_v21  ;;  %1540 = vst.msk [vmem:[%s2439_s5 + $0x8] sm:$0xff] %vm401_vm4, %v1535_v22 }
 0x59a   : > { %1541 = vst.msk [vmem:[%s2439_s5 + $0x10] sm:$0xff] %vm401_vm4, %v1536_v26  ;;  %1542 = vst.msk [vmem:[%s2439_s5 + $0x18] sm:$0xff] %vm401_vm4, %v1537_v27  ;;  %v1567_v32 = vrot.slane %v1553_v31, %v2246_v18 }
 0x59b   : > { %1543 = vst.msk [vmem:[%s2439_s5 + $0x20] sm:$0x3] %vm1516_vm12, %v1538_v28 }
 0x59c   : > { %1570 = vst.msk [vmem:[#allocation7] sm:$0x1] %vm899_vm7, %v1560_v30  ;;  %1571 = vst.msk [vmem:[#allocation7 + $0x1] sm:$0x1] %vm899_vm7, %v1567_v32 }
 0x59d PF: > { %p2401_p10 = scmp.eq.s32.totalorder %s1712_s27, 3  ;;  %s2093_s13 = smov [#allocation7]  }
 0x59e   : > { %s1590_s14 = sshll.u32 %s2093_s13, 4  ;;  %s1591_s14 = int_to_ptr.vmem [resolvable:$true] %s1590_s14 }
 0x59f   : > { %s2003_s16 = scalar_lea.vmem %s1591_s14, 32  ;;  %p2010_p0 = scmp.lt.s32.totalorder %s1591_s14, %s1591_s14 }
 0x5a0   : > { %p2004_p11 = scmp.ne.s32.totalorder %s1591_s14, %s2003_s16  ;;  %p2011_p1 = scmp.lt.s32.totalorder %s2003_s16, %s2003_s16 }
 0x5a2   : > { %p2005_p12 = pnand %p2004_p11, %p2401_p10  ;;  %p2012_p2 = por %p2011_p1, %p2010_p0 }
 0x5a4   : > { %p2006_p13 = pneg %p2005_p12 }
 0x5a6   : > { %p2013_p3 = pnand %p2012_p2, %p2006_p13 }
 0x5a8   : > { %2016 = shalt.err (!%p2013_p3)
}
 0x5a9   : > { %s2094_s15 = smov 16   ;;  %s2095_s27 = smov 1  }
 0x5aa   : > { %1875 = dma.vmem_to_hbm [thread:$0]  (%p2401_p10), %s1591_s14, 32, %s2440_s6, [#allocation6], %s2094_s15, %s2094_s15, %s2095_s27  }
 0x5ab   : > { %2056 = dma.done.wait (%p2401_p10), [#allocation6], 32  }
 0x5ac   : > { %2058 = vsyncadd (%p2401_p10), [#allocation6], 4294967264 }
 0x5ad PF: > { %s21_s26 = sadd.s32 1, %s2081_s26   ;;  %s2445_s21 = smov %s2065_s22 }
 0x5ae   : > { %p18_p4 = scmp.ge.s32.totalorder %s21_s26, 6   ;;  %s2446_s22 = smov %s2069_s23 }
 0x5af   : > { %s2447_s23 = smov %s2182_s9  ;;  %s2448_s24 = smov %s2077_s25 }
 0x5b0   : > { %s2449_s25 = smov %s2451_s28  ;;  %20 = sbr.rel (!%p18_p4) target bundleno = 5 (0x5), region = 107 }
 0x5b5   :  { %1614 = vsyncpa [#allocation5], 1 }
 0x5b6   :  { %1616 = vsyncpa [#allocation5 + $0x1], 1 }
 0x5b7   :  { %1617 = vsyncpa [#allocation6], 1 }
 0x5b8   :  { %1619 = vsyncpa [#allocation6 + $0x1], 1 }

</bundles_post_ra>
